<compile_context>
chip_gen: v5e
topology: v5e:2x2
jax: 0.10.0
libtpu: 0.0.40
codegen_flags: <defaults>
</compile_context>

<pallas_src>
import jax
import jax.numpy as jnp
from jax.experimental import pallas as pl
from jax.experimental.pallas import tpu as pltpu


# --------------------------------------------------------------------------
# Kernels
# --------------------------------------------------------------------------

def _hash_fused_kernel(xi_ref, xt_ref, wi_ref, bi_ref, wt_ref, bt_ref, o_ref):
    # Two small matmuls (MXU, f32 accumulate) + bias + tanh (EUP), fused so the
    # store is a single lane-dense slab [TB, 2*D_out].
    img = jnp.dot(xi_ref[...], wi_ref[...], preferred_element_type=jnp.float32)
    img = jnp.tanh(img + bi_ref[...])
    txt = jnp.dot(xt_ref[...], wt_ref[...], preferred_element_type=jnp.float32)
    txt = jnp.tanh(txt + bt_ref[...])
    o_ref[...] = jnp.concatenate([img, txt], axis=-1).astype(o_ref.dtype)


def _linear_hash_kernel(x_ref, w_ref, b_ref, o_ref):
    acc = jnp.dot(x_ref[...], w_ref[...], preferred_element_type=jnp.float32)
    o_ref[...] = jnp.tanh(acc + b_ref[...]).astype(o_ref.dtype)


# --------------------------------------------------------------------------
# Wrappers
# --------------------------------------------------------------------------

_DEFAULT_TB = 512  # double-buffered f32 tiles stay well under v7x VMEM budget


def _tile_and_pad(B, tb):
    """Pick a batch tile (multiple of 8) and the padded batch size."""
    if B <= tb:
        TB = max(8, ((B + 7) // 8) * 8)
    else:
        TB = tb
    padded_B = pl.cdiv(B, TB) * TB
    return TB, padded_B


def _pad_rows(x, padded_B):
    B = x.shape[0]
    if padded_B == B:
        return x
    return jnp.pad(x, ((0, padded_B - B), (0, 0)))


def hash_forward_fused(img, txt, w_img, b_img, w_txt, b_txt, *, tb=_DEFAULT_TB):
    """Fused tanh(img @ W_img + b_img), tanh(txt @ W_txt + b_txt)."""
    B, D_in = img.shape
    D_out = w_img.shape[1]
    TB, padded_B = _tile_and_pad(B, tb)

    img_p = _pad_rows(img, padded_B)
    txt_p = _pad_rows(txt, padded_B)
    bi2 = b_img.reshape(1, D_out)
    bt2 = b_txt.reshape(1, D_out)

    cost = pl.CostEstimate(
        flops=4 * padded_B * D_in * D_out,           # two matmuls
        transcendentals=2 * padded_B * D_out,        # tanh on both streams
        bytes_accessed=4 * (2 * padded_B * D_in      # activations in
                            + 2 * (D_in * D_out + D_out)  # weights + biases
                            + padded_B * 2 * D_out),      # output slab
    )

    out = pl.pallas_call(
        _hash_fused_kernel,
        out_shape=jax.ShapeDtypeStruct((padded_B, 2 * D_out), jnp.float32),
        grid_spec=pltpu.PrefetchScalarGridSpec(
            num_scalar_prefetch=0,
            grid=(padded_B // TB,),
            in_specs=[
                pl.BlockSpec((TB, D_in), lambda i: (i, 0)),      # img tile
                pl.BlockSpec((TB, D_in), lambda i: (i, 0)),      # txt tile
                pl.BlockSpec((D_in, D_out), lambda i: (0, 0)),   # W_img (resident)
                pl.BlockSpec((1, D_out), lambda i: (0, 0)),      # b_img
                pl.BlockSpec((D_in, D_out), lambda i: (0, 0)),   # W_txt (resident)
                pl.BlockSpec((1, D_out), lambda i: (0, 0)),      # b_txt
            ],
            out_specs=pl.BlockSpec((TB, 2 * D_out), lambda i: (i, 0)),
        ),
        compiler_params=pltpu.CompilerParams(
            dimension_semantics=("parallel",)),
        cost_estimate=cost,
    )(img_p, txt_p, w_img, bi2, w_txt, bt2)

    return out[:B, :D_out], out[:B, D_out:]


def linear_hash(x, w, b, *, tb=_DEFAULT_TB):
    """Single-stream tanh(x @ w + b), batch-tiled."""
    B, D_in = x.shape
    D_out = w.shape[1]
    TB, padded_B = _tile_and_pad(B, tb)

    x_p = _pad_rows(x, padded_B)
    b2 = b.reshape(1, D_out)

    cost = pl.CostEstimate(
        flops=2 * padded_B * D_in * D_out,
        transcendentals=padded_B * D_out,
        bytes_accessed=4 * (padded_B * D_in + D_in * D_out + D_out
                            + padded_B * D_out),
    )

    out = pl.pallas_call(
        _linear_hash_kernel,
        out_shape=jax.ShapeDtypeStruct((padded_B, D_out), jnp.float32),
        grid_spec=pltpu.PrefetchScalarGridSpec(
            num_scalar_prefetch=0,
            grid=(padded_B // TB,),
            in_specs=[
                pl.BlockSpec((TB, D_in), lambda i: (i, 0)),
                pl.BlockSpec((D_in, D_out), lambda i: (0, 0)),
                pl.BlockSpec((1, D_out), lambda i: (0, 0)),
            ],
            out_specs=pl.BlockSpec((TB, D_out), lambda i: (i, 0)),
        ),
        compiler_params=pltpu.CompilerParams(
            dimension_semantics=("parallel",)),
        cost_estimate=cost,
    )(x_p, w, b2)

    return out[:B]


# --------------------------------------------------------------------------
# Module
# --------------------------------------------------------------------------

class HashLayerPallas:
    """JAX/Pallas equivalent of the PyTorch HashLayer module (eval mode)."""

    def __init__(self, key, input_dim=512, output_dim=64):
        # Deterministic init mimicking nn.Linear: U(-1/sqrt(in), 1/sqrt(in)).
        k1, k2, k3, k4 = jax.random.split(key, 4)
        bound = 1.0 / jnp.sqrt(jnp.float32(input_dim))
        # Stored as (in_dim, out_dim) == torch weight transposed.
        self.w_img = jax.random.uniform(
            k1, (input_dim, output_dim), jnp.float32, -bound, bound)
        self.b_img = jax.random.uniform(
            k2, (output_dim,), jnp.float32, -bound, bound)
        self.w_txt = jax.random.uniform(
            k3, (input_dim, output_dim), jnp.float32, -bound, bound)
        self.b_txt = jax.random.uniform(
            k4, (output_dim,), jnp.float32, -bound, bound)

    def encode_img(self, embeds):
        return linear_hash(embeds, self.w_img, self.b_img)

    def encode_txt(self, embeds):
        return linear_hash(embeds, self.w_txt, self.b_txt)

    def quantization(self, code):
        return jnp.tanh(code)

    def __call__(self, img_embeds, txt_embeds):
        # Fused single-launch path: both streams in one pallas_call with a
        # lane-dense concatenated output.
        return hash_forward_fused(
            img_embeds, txt_embeds,
            self.w_img, self.b_img, self.w_txt, self.b_txt)


if __name__ == "__main__":
    key = jax.random.PRNGKey(0)
    k_params, k_img, k_txt = jax.random.split(key, 3)

    batch = 8
    input_dim = 32
    output_dim = 16

    layer = HashLayerPallas(k_params, input_dim=input_dim, output_dim=output_dim)

    img_embeds = jax.random.normal(k_img, (batch, input_dim), jnp.float32)
    txt_embeds = jax.random.normal(k_txt, (batch, input_dim), jnp.float32)

    # Fused forward.
    img_hash, txt_hash = layer(img_embeds, txt_embeds)
    jax.block_until_ready((img_hash, txt_hash))

    # Individual encoders (single-stream tiled kernel).
    img_only = layer.encode_img(img_embeds)
    txt_only = layer.encode_txt(txt_embeds)
    jax.block_until_ready((img_only, txt_only))

    # Reference check against plain JAX.
    ref_img = jnp.tanh(img_embeds @ layer.w_img + layer.b_img)
    ref_txt = jnp.tanh(txt_embeds @ layer.w_txt + layer.b_txt)
    assert img_hash.shape == (batch, output_dim)
    assert txt_hash.shape == (batch, output_dim)
    assert jnp.allclose(img_hash, ref_img, atol=1e-5)
    assert jnp.allclose(txt_hash, ref_txt, atol=1e-5)
    assert jnp.allclose(img_only, ref_img, atol=1e-5)
    assert jnp.allclose(txt_only, ref_txt, atol=1e-5)

    print("KERNEL_OK")
</pallas_src>

<mosaic_0001>
module attributes {stable_mosaic.version = 11 : i64} {
  func.func @_hash_fused_kernel(%arg0: i32, %arg1: memref<8x32xf32, #tpu.memory_space<vmem>>, %arg2: memref<8x32xf32, #tpu.memory_space<vmem>>, %arg3: memref<32x16xf32, #tpu.memory_space<vmem>>, %arg4: memref<1x16xf32, #tpu.memory_space<vmem>>, %arg5: memref<32x16xf32, #tpu.memory_space<vmem>>, %arg6: memref<1x16xf32, #tpu.memory_space<vmem>>, %arg7: memref<8x32xf32, #tpu.memory_space<vmem>>) attributes {dimension_semantics = [#tpu.dimension_semantics<parallel>], iteration_bounds = array<i64: 1>, scalar_prefetch = 0 : i64, scratch_operands = 0 : i64, tpu.core_type = #tpu.core_type<tc>, window_params = [{transform_indices = @transform_0, window_bounds = array<i64: 8, 32>}, {transform_indices = @transform_1, window_bounds = array<i64: 8, 32>}, {pipeline_mode = #tpu.pipeline_mode<synchronous>, transform_indices = @transform_2, window_bounds = array<i64: 32, 16>}, {pipeline_mode = #tpu.pipeline_mode<synchronous>, transform_indices = @transform_3, window_bounds = array<i64: 1, 16>}, {pipeline_mode = #tpu.pipeline_mode<synchronous>, transform_indices = @transform_4, window_bounds = array<i64: 32, 16>}, {pipeline_mode = #tpu.pipeline_mode<synchronous>, transform_indices = @transform_5, window_bounds = array<i64: 1, 16>}, {transform_indices = @transform_6, window_bounds = array<i64: 8, 32>}]} {
    %c0 = arith.constant 0 : index
    %c0_0 = arith.constant 0 : index
    %0 = vector.load %arg1[%c0, %c0_0] : memref<8x32xf32, #tpu.memory_space<vmem>>, vector<8x32xf32>
    %c0_1 = arith.constant 0 : index
    %c0_2 = arith.constant 0 : index
    %1 = vector.load %arg3[%c0_1, %c0_2] : memref<32x16xf32, #tpu.memory_space<vmem>>, vector<32x16xf32>
    %cst = arith.constant dense<0.000000e+00> : vector<8x16xf32>
    %2 = tpu.matmul %0, %1, %cst {dimension_numbers = #tpu.dot_dimension_numbers<[1], [0], [0], [1], [0, 0, 1, 1], [], []>} : vector<8x32xf32>, vector<32x16xf32>, vector<8x16xf32> -> vector<8x16xf32>
    %c0_3 = arith.constant 0 : index
    %c0_4 = arith.constant 0 : index
    %3 = vector.load %arg4[%c0_3, %c0_4] : memref<1x16xf32, #tpu.memory_space<vmem>>, vector<1x16xf32>
    %4 = vector.broadcast %3 : vector<1x16xf32> to vector<8x16xf32>
    %5 = arith.addf %2, %4 : vector<8x16xf32>
    %6 = math.tanh %5 : vector<8x16xf32>
    %c0_5 = arith.constant 0 : index
    %c0_6 = arith.constant 0 : index
    %7 = vector.load %arg2[%c0_5, %c0_6] : memref<8x32xf32, #tpu.memory_space<vmem>>, vector<8x32xf32>
    %c0_7 = arith.constant 0 : index
    %c0_8 = arith.constant 0 : index
    %8 = vector.load %arg5[%c0_7, %c0_8] : memref<32x16xf32, #tpu.memory_space<vmem>>, vector<32x16xf32>
    %cst_9 = arith.constant dense<0.000000e+00> : vector<8x16xf32>
    %9 = tpu.matmul %7, %8, %cst_9 {dimension_numbers = #tpu.dot_dimension_numbers<[1], [0], [0], [1], [0, 0, 1, 1], [], []>} : vector<8x32xf32>, vector<32x16xf32>, vector<8x16xf32> -> vector<8x16xf32>
    %c0_10 = arith.constant 0 : index
    %c0_11 = arith.constant 0 : index
    %10 = vector.load %arg6[%c0_10, %c0_11] : memref<1x16xf32, #tpu.memory_space<vmem>>, vector<1x16xf32>
    %11 = vector.broadcast %10 : vector<1x16xf32> to vector<8x16xf32>
    %12 = arith.addf %9, %11 : vector<8x16xf32>
    %13 = math.tanh %12 : vector<8x16xf32>
    %14 = tpu.concatenate %6, %13 in 1 : vector<8x16xf32>, vector<8x16xf32> -> vector<8x32xf32>
    %c0_12 = arith.constant 0 : index
    %c0_13 = arith.constant 0 : index
    %15 = vector.load %arg7[%c0_12, %c0_13] : memref<8x32xf32, #tpu.memory_space<vmem>>, vector<8x32xf32>
    tpu.vector_store %arg7[%c0_12, %c0_13], %14 {strides = array<i32>} : memref<8x32xf32, #tpu.memory_space<vmem>>, vector<8x32xf32>,
    return
  }
  func.func @transform_0(%arg0: i32) -> (i32, i32) {
    %c0_i32 = arith.constant 0 : i32
    %c0_i32_0 = arith.constant 0 : i32
    return %arg0, %c0_i32 : i32, i32
  }
  func.func @transform_1(%arg0: i32) -> (i32, i32) {
    %c0_i32 = arith.constant 0 : i32
    %c0_i32_0 = arith.constant 0 : i32
    return %arg0, %c0_i32 : i32, i32
  }
  func.func @transform_2(%arg0: i32) -> (i32, i32) {
    %c0_i32 = arith.constant 0 : i32
    %c0_i32_0 = arith.constant 0 : i32
    %c0_i32_1 = arith.constant 0 : i32
    return %c0_i32, %c0_i32_0 : i32, i32
  }
  func.func @transform_3(%arg0: i32) -> (i32, i32) {
    %c0_i32 = arith.constant 0 : i32
    %c0_i32_0 = arith.constant 0 : i32
    %c0_i32_1 = arith.constant 0 : i32
    return %c0_i32, %c0_i32_0 : i32, i32
  }
  func.func @transform_4(%arg0: i32) -> (i32, i32) {
    %c0_i32 = arith.constant 0 : i32
    %c0_i32_0 = arith.constant 0 : i32
    %c0_i32_1 = arith.constant 0 : i32
    return %c0_i32, %c0_i32_0 : i32, i32
  }
  func.func @transform_5(%arg0: i32) -> (i32, i32) {
    %c0_i32 = arith.constant 0 : i32
    %c0_i32_0 = arith.constant 0 : i32
    %c0_i32_1 = arith.constant 0 : i32
    return %c0_i32, %c0_i32_0 : i32, i32
  }
  func.func @transform_6(%arg0: i32) -> (i32, i32) {
    %c0_i32 = arith.constant 0 : i32
    %c0_i32_0 = arith.constant 0 : i32
    return %arg0, %c0_i32 : i32, i32
  }
}

</mosaic_0001>

<bundles_post_ra>
// kernel: tpu_custom_call.1
= control target key start
LH: loop header
LB: loop body
LE: loop exit
PB: predicated region body
PF: predicated region fallthrough
CT: control target
= control target key end

     0   :  { %s229_s0 = inlined_call_operand.vmem [shape: f32[8,32], index: 0, kind: input, shape index: {}]   ;;  %s230_s1 = inlined_call_operand.vmem [shape: f32[8,32], index: 1, kind: input, shape index: {}]   ;;  %s231_s2 = inlined_call_operand.vmem [shape: f32[32,16], index: 2, kind: input, shape index: {}]   ;;  %s232_s3 = inlined_call_operand.vmem [shape: f32[1,16], index: 3, kind: input, shape index: {}]   ;;  %s233_s4 = inlined_call_operand.vmem [shape: f32[32,16], index: 4, kind: input, shape index: {}]   ;;  %s234_s5 = inlined_call_operand.vmem [shape: f32[1,16], index: 5, kind: input, shape index: {}]   ;;  %s235_s6 = inlined_call_operand.hbm [shape: f32[8,32], index: 6, kind: output, shape index: {}]  }
   0x1   :  { %v62_v0 = vld [vmem:[%s233_s4 + $0x18] sm:$0xff]  ;;  %v61_v1 = vld [vmem:[%s233_s4 + $0x10] sm:$0xff]  ;;  %v60_v3 = vld [vmem:[%s233_s4 + $0x8] sm:$0xff] }
   0x2   :  { %82 = vmatpush.msra.mxu1 %v62_v0  ;;  %v28_v2 = vld [vmem:[%s231_s2 + $0x18] sm:$0xff]  ;;  %v27_v4 = vld [vmem:[%s231_s2 + $0x10] sm:$0xff]  ;;  %v26_v5 = vld [vmem:[%s231_s2 + $0x8] sm:$0xff] }
   0x3   :  { %49 = vmatpush.msra.mxu0 %v28_v2  ;;  %v59_v6 = vld [vmem:[%s233_s4] sm:$0xff] }
   0x4   :  { %83 = vmatpush.msra.mxu1 %v61_v1 }
   0x5   :  { %50 = vmatpush.msra.mxu0 %v27_v4 }
   0x6   :  { %11 = vsyncpa [#allocation3], 0  ;;  %84 = vmatpush.msra.mxu1 %v60_v3  ;;  %vm33_vm0 = vcmask 261120   ;;  %v58_v7 = vld [vmem:[%s230_s1] sm:$0xff]  ;;  %s150_s1 = smov 16   ;;  %s105_s22 = sshll.u32 %s235_s6, 4  ;;  %s106_s22 = int_to_ptr.hbm [resolvable:$true] %s105_s22 }
   0x7   :  { %v25_v8 = vld [vmem:[%s231_s2] sm:$0xff]  ;;  %51 = vmatpush.msra.mxu0 %v26_v5  ;;  %vm95_vm1 = vcmask 130048  }
   0x8   :  { %v24_v9 = vld [vmem:[%s229_s0] sm:$0xff]  ;;  %85 = vmatpush.msra.mxu1 %v59_v6  ;;  %s151_s0 = smov [#allocation2]  }
   0x9   :  { %115 = vmatmul.msk.f32.vlgmr.msra.gmra.mxu1 %vm33_vm0, %v58_v7  ;;  %52 = vmatpush.msra.mxu0 %v25_v8  ;;  %v118_v10 = vld [vmem:[%s234_s5] ss:$0 sm:$0xff]  ;;  %s103_s19 = sshll.u32 %s151_s0, 4  ;;  %s104_s19 = int_to_ptr.vmem [resolvable:$true] %s103_s19 }
   0xa   :  { %114 = vmatmul.msk.f32.vlgmr.msra.gmra.mxu0 %vm33_vm0, %v24_v9  ;;  %v119_v14 = vld [vmem:[%s232_s3] ss:$0 sm:$0xff] }
  0x86   :  { %v87_v11 = vpop.f32.mrf.mxu1 }
  0x87   :  { %v88_v12 = vadd.f32 %v118_v10, %v87_v11  ;;  %v54_v15 = vpop.f32.mrf.mxu0 }
  0x88   :  { %v55_v16 = vadd.f32 %v119_v14, %v54_v15 }
  0x89   :  { %120 = vtanh.f32 %v88_v12 }
  0x8a   :  { %122 = vtanh.f32 %v55_v16 }
  0x8f   :  { %v121_v13 = vpop.eup %120 }
  0x90   :  { %92 = vrot.lane.b32.xlu0 %v121_v13, %s150_s1  ;;  %v123_v17 = vpop.eup %122 }
 0x102   :  { %v93_v18 = vpop.permute.xlu0 %92 }
 0x103   :  { %v96_v19 = vsel %vm95_vm1, %v123_v17, %v93_v18 }
 0x104   :  { %97 = vst.msk [vmem:[#allocation2] sm:$0xff] %vm33_vm0, %v96_v19 }
 0x105   :  { %108 = dma.vmem_to_hbm [thread:$0]  %s104_s19, 128, %s106_s22, [#allocation3]  }
 0x106   :  { %148 = dma.done.wait [#allocation3], 128  }
 0x107   :  { %149 = vsyncadd [#allocation3], 4294967168 }
 0x108   :  { %113 = vsyncpa [#allocation3], 1 }

</bundles_post_ra>
